<compile_context>
chip_gen: v7x
topology: tpu7x:2x2x1
jax: 0.10.0
libtpu: 0.0.40
codegen_flags: <defaults>
</compile_context>

<pallas_src>
import functools

import jax
import jax.numpy as jnp
from jax import lax
from jax.experimental import pallas as pl
from jax.experimental.pallas import tpu as pltpu


def _round_up(n, m):
    return (n + m - 1) // m * m


def _is_pow2(n):
    return n > 0 and (n & (n - 1)) == 0


# Residency thresholds: slab must fit comfortably together with its W
# temporaries inside the scoped-VMEM budget on all generations (v7x: 64 MiB
# physical per TC -> keep total well under half of it).
_RESIDENT_SLAB_BYTES = 8 * 1024 * 1024
_RESIDENT_GMAX = 16384


def _vmem_limit(*byte_counts):
    """Explicit scoped-VMEM limit with headroom, capped for v7x (64 MiB)."""
    need = sum(int(b) for b in byte_counts) + (2 << 20)
    return int(min(max(need, 32 << 20), 56 << 20))


# ---------------------------------------------------------------------------
# Tent-weight builder (traced inside the kernels).
#
# For a query (u, v) clamped to [0, res_l-1] in pixel units and a flat grid
# index g = off_l + gy*res_l + gx, the clamped-border bilinear weight of cell
# g is  max(0, 1-|u-gx|) * max(0, 1-|v-gy|)  (separable tent).  Cells outside
# this level's range (gy < 0 or gy >= res_l) automatically get weight 0, so
# the same expression works on the concatenated / padded mip pool.
# ---------------------------------------------------------------------------
def _tent_weights(x, gflat, res_l, off_l):
    rel = gflat - off_l                                       # (1, tk) int32
    if _is_pow2(res_l):
        s = res_l.bit_length() - 1
        gx = (rel & (res_l - 1)).astype(jnp.float32)
        gy = (rel >> s).astype(jnp.float32)                   # arithmetic shift
    else:
        relf = rel.astype(jnp.float32)
        gy = jnp.floor(relf / float(res_l))
        gx = relf - gy * float(res_l)
    u = jnp.clip(x[:, 0:1] * res_l - 0.5, 0.0, res_l - 1.0)   # (tb, 1)
    v = jnp.clip(x[:, 1:2] * res_l - 0.5, 0.0, res_l - 1.0)
    wx = jnp.maximum(0.0, 1.0 - jnp.abs(u - gx))              # (tb, tk)
    wy = jnp.maximum(0.0, 1.0 - jnp.abs(v - gy))
    return wx * wy


# ---------------------------------------------------------------------------
# fetch_2d kernels (no mip-mapping)
# ---------------------------------------------------------------------------
def _fetch2d_resident_kernel(x_ref, mat_ref, o_ref, *, res, chunk, gp):
    """Whole slab VMEM-resident; grid is batch-only."""
    x = x_ref[...]                                            # (tb, 2) f32
    acc = jnp.zeros((x.shape[0], o_ref.shape[1]), jnp.float32)
    for c0 in range(0, gp, chunk):                            # static unroll
        gflat = lax.broadcasted_iota(jnp.int32, (1, chunk), 1) + c0
        W = _tent_weights(x, gflat, res, 0).astype(jnp.bfloat16)
        acc = acc + jnp.dot(W, mat_ref[pl.ds(c0, chunk), :],
                            preferred_element_type=jnp.float32)
    o_ref[...] = acc


def _fetch2d_stream_kernel(x_ref, mat_ref, o_ref, acc_ref, *, res, tk):
    """Streamed fallback (K grid axis) for slabs that do not fit VMEM."""
    k = pl.program_id(1)

    @pl.when(k == 0)
    def _init():
        acc_ref[...] = jnp.zeros_like(acc_ref)

    x = x_ref[...]
    gflat = lax.broadcasted_iota(jnp.int32, (1, tk), 1) + k * tk
    W = _tent_weights(x, gflat, res, 0).astype(jnp.bfloat16)
    acc_ref[...] += jnp.dot(W, mat_ref[...],
                            preferred_element_type=jnp.float32)

    @pl.when(k == pl.num_programs(1) - 1)
    def _done():
        o_ref[...] = acc_ref[...].astype(o_ref.dtype)


def fetch_2d_pallas(x, plane_slab, *, res, feature_size, tk, resident, tb=128):
    """x: (B, 2) in [0,1]; plane_slab: (Gp, Cp) bf16 flattened plane."""
    B = x.shape[0]
    Bp = max(_round_up(max(B, 1), tb), tb)
    Gp, Cp = plane_slab.shape
    xp = jnp.pad(x.astype(jnp.float32), ((0, Bp - B), (0, 0)))

    if resident:
        kernel = functools.partial(_fetch2d_resident_kernel,
                                   res=res, chunk=tk, gp=Gp)
        out = pl.pallas_call(
            kernel,
            out_shape=jax.ShapeDtypeStruct((Bp, Cp), jnp.float32),
            grid_spec=pltpu.PrefetchScalarGridSpec(
                num_scalar_prefetch=0,
                grid=(Bp // tb,),
                in_specs=[pl.BlockSpec((tb, 2), lambda i: (i, 0)),
                          # constant block index -> slab DMA'd once, reused
                          pl.BlockSpec((Gp, Cp), lambda i: (0, 0))],
                out_specs=pl.BlockSpec((tb, Cp), lambda i: (i, 0))),
            compiler_params=pltpu.CompilerParams(
                dimension_semantics=("parallel",),
                vmem_limit_bytes=_vmem_limit(2 * Gp * Cp * 2,
                                             3 * tb * Cp * 4,
                                             tb * tk * 8)),
        )(xp, plane_slab)
    else:
        kernel = functools.partial(_fetch2d_stream_kernel, res=res, tk=tk)
        out = pl.pallas_call(
            kernel,
            out_shape=jax.ShapeDtypeStruct((Bp, Cp), jnp.float32),
            grid_spec=pltpu.PrefetchScalarGridSpec(
                num_scalar_prefetch=0,
                grid=(Bp // tb, Gp // tk),
                in_specs=[pl.BlockSpec((tb, 2), lambda i, k: (i, 0)),
                          pl.BlockSpec((tk, Cp), lambda i, k: (k, 0))],
                out_specs=pl.BlockSpec((tb, Cp), lambda i, k: (i, 0)),
                scratch_shapes=[pltpu.VMEM((tb, Cp), jnp.float32)]),
            compiler_params=pltpu.CompilerParams(
                dimension_semantics=("parallel", "arbitrary"),
                vmem_limit_bytes=_vmem_limit(4 * tk * Cp,
                                             3 * tb * Cp * 4,
                                             tb * tk * 8)),
        )(xp, plane_slab)
    return out[:B, :feature_size]


# ---------------------------------------------------------------------------
# fetch_mip_2d kernels (trilinear fetch from the flattened mip pool)
#
# The query block q packs [x0, x1, alpha_0 .. alpha_{level-1}, pad] per row;
# the per-level blend weights alpha are precomputed in the XLA wrapper so the
# log2/floor level-selection math never runs on the kernel's VALU/EUP path.
# ---------------------------------------------------------------------------
def _fetch_mip2d_resident_kernel(q_ref, pool_ref, o_ref, *,
                                 res, level, offsets, chunk, gp):
    q = q_ref[...]                                            # (tb, Pq)
    x = q[:, 0:2]
    acc = jnp.zeros((q.shape[0], o_ref.shape[1]), jnp.float32)
    for c0 in range(0, gp, chunk):                            # static unroll
        gflat = lax.broadcasted_iota(jnp.int32, (1, chunk), 1) + c0
        W = None
        for lv in range(level):
            lo, hi = offsets[lv], offsets[lv + 1]
            if c0 >= hi or c0 + chunk <= lo:
                continue                      # static skip: level not in chunk
            res_l = res // (2 ** lv)
            alpha = q[:, 2 + lv:3 + lv]
            contrib = alpha * _tent_weights(x, gflat, res_l, lo)
            W = contrib if W is None else W + contrib
        if W is None:
            continue                          # chunk is pure padding
        acc = acc + jnp.dot(W.astype(jnp.bfloat16),
                            pool_ref[pl.ds(c0, chunk), :],
                            preferred_element_type=jnp.float32)
    o_ref[...] = acc


def _fetch_mip2d_stream_kernel(q_ref, pool_ref, o_ref, acc_ref, w_ref, *,
                               res, level, offsets, tk):
    k = pl.program_id(1)

    @pl.when(k == 0)
    def _init():
        acc_ref[...] = jnp.zeros_like(acc_ref)

    q = q_ref[...]
    x = q[:, 0:2]
    gflat = lax.broadcasted_iota(jnp.int32, (1, tk), 1) + k * tk

    # Build W in a VMEM scratch; each level's tent build runs only when this
    # K tile overlaps that level's static flat-index range.
    w_ref[...] = jnp.zeros_like(w_ref)
    for lv in range(level):
        lo, hi = offsets[lv], offsets[lv + 1]
        res_l = res // (2 ** lv)

        @pl.when((k * tk < hi) & ((k + 1) * tk > lo))
        def _add(lv=lv, lo=lo, res_l=res_l):
            alpha = q[:, 2 + lv:3 + lv]
            w_ref[...] += alpha * _tent_weights(x, gflat, res_l, lo)

    acc_ref[...] += jnp.dot(w_ref[...].astype(jnp.bfloat16), pool_ref[...],
                            preferred_element_type=jnp.float32)

    @pl.when(k == pl.num_programs(1) - 1)
    def _done():
        o_ref[...] = acc_ref[...].astype(o_ref.dtype)


def _mip_query(x, r, res, level, Bp):
    """Pack x and per-level blend weights into one lane-friendly block."""
    B = x.shape[0]
    li = jnp.clip(jnp.log2(2.0 * r.astype(jnp.float32) * res),
                  0.0, float(level - 1))
    l0 = jnp.floor(li)
    wl = li - l0
    l0i = l0.astype(jnp.int32)
    l1i = jnp.minimum(l0i + 1, level - 1)
    lv = jnp.arange(level)[None, :]
    alpha = (jnp.where(l0i[:, None] == lv, (1.0 - wl)[:, None], 0.0)
             + jnp.where(l1i[:, None] == lv, wl[:, None], 0.0))   # (B, level)
    Pq = max(8, 2 + level)
    q = jnp.zeros((Bp, Pq), jnp.float32)
    q = q.at[:B, 0:2].set(x.astype(jnp.float32))
    q = q.at[:B, 2:2 + level].set(alpha)
    return q


def fetch_mip_2d_pallas(x, r, pool_slab, *, offsets, res, level,
                        feature_size, tk, resident, tb=128):
    """x: (B,2); r: (B,); pool_slab: (Tp, Cp) bf16 flattened mip pool."""
    B = x.shape[0]
    Bp = max(_round_up(max(B, 1), tb), tb)
    Tp, Cp = pool_slab.shape
    q = _mip_query(x, r, res, level, Bp)
    Pq = q.shape[1]
    offs = tuple(int(o) for o in offsets)

    if resident:
        kernel = functools.partial(_fetch_mip2d_resident_kernel, res=res,
                                   level=level, offsets=offs, chunk=tk, gp=Tp)
        out = pl.pallas_call(
            kernel,
            out_shape=jax.ShapeDtypeStruct((Bp, Cp), jnp.float32),
            grid_spec=pltpu.PrefetchScalarGridSpec(
                num_scalar_prefetch=0,
                grid=(Bp // tb,),
                in_specs=[pl.BlockSpec((tb, Pq), lambda i: (i, 0)),
                          pl.BlockSpec((Tp, Cp), lambda i: (0, 0))],
                out_specs=pl.BlockSpec((tb, Cp), lambda i: (i, 0))),
            compiler_params=pltpu.CompilerParams(
                dimension_semantics=("parallel",),
                vmem_limit_bytes=_vmem_limit(2 * Tp * Cp * 2,
                                             3 * tb * Cp * 4,
                                             tb * tk * 8)),
        )(q, pool_slab)
    else:
        kernel = functools.partial(_fetch_mip2d_stream_kernel, res=res,
                                   level=level, offsets=offs, tk=tk)
        out = pl.pallas_call(
            kernel,
            out_shape=jax.ShapeDtypeStruct((Bp, Cp), jnp.float32),
            grid_spec=pltpu.PrefetchScalarGridSpec(
                num_scalar_prefetch=0,
                grid=(Bp // tb, Tp // tk),
                in_specs=[pl.BlockSpec((tb, Pq), lambda i, k: (i, 0)),
                          pl.BlockSpec((tk, Cp), lambda i, k: (k, 0))],
                out_specs=pl.BlockSpec((tb, Cp), lambda i, k: (i, 0)),
                scratch_shapes=[pltpu.VMEM((tb, Cp), jnp.float32),
                                pltpu.VMEM((tb, tk), jnp.float32)]),
            compiler_params=pltpu.CompilerParams(
                dimension_semantics=("parallel", "arbitrary"),
                vmem_limit_bytes=_vmem_limit(4 * tk * Cp,
                                             3 * tb * Cp * 4,
                                             tb * tk * 12)),
        )(q, pool_slab)
    return out[:B, :feature_size]


# ---------------------------------------------------------------------------
# Weight-slab preparation (done once, cached on the module)
# ---------------------------------------------------------------------------
def _prep_slab(flat_gc, feature_size, cap_tk=4096):
    """(G, C) f32 -> lane-dense bf16 (Gp, Cp) slab + K tile + residency flag."""
    G = flat_gc.shape[0]
    tk = min(_round_up(G, 128), cap_tk)       # multiple of 128, bounded VMEM
    Gp = _round_up(G, tk)
    Cp = _round_up(feature_size, 128)         # lane-dense output / matmul N
    slab = jnp.pad(flat_gc.astype(jnp.bfloat16),
                   ((0, Gp - G), (0, Cp - feature_size)))
    resident = (Gp * Cp * 2 <= _RESIDENT_SLAB_BYTES) and (Gp <= _RESIDENT_GMAX)
    return slab, tk, resident


# ---------------------------------------------------------------------------
# JAX-side module mirroring PlaneEncoding
# ---------------------------------------------------------------------------
class PlaneEncoding:
    def __init__(self, feature_size, res, level, key, tb=128):
        self.feature_size = feature_size
        self.res = res
        self.level = level
        # tb=128 fills MXU M on v5e; 256 is also fine on v6e/v7x, but keep a
        # second batch tile available so the "parallel" axis can shard across
        # v7x's two TensorCores for medium batches.
        self.tb = tb
        offsets = [0]
        for i in range(level):
            offsets.append(offsets[-1] + (res // 2 ** i) ** 2)
        self.offsets = offsets
        self.n_output_dims = feature_size
        # deterministic stand-in for 0.1 * torch.randn(1, C, res, res)
        self.mat = 0.1 * jax.random.normal(
            key, (1, feature_size, res, res), jnp.float32)
        # Cached padded bf16 slabs (weights are static in this port; call
        # _build_caches() again if self.mat is updated).
        self._build_caches()

    def _mip_planes(self):
        """Per-level f32 planes (avg_pool2d(2,2) == 2x2 block mean)."""
        planes = [self.mat]
        m = self.mat
        for _ in range(1, self.level):
            _, C, H, W = m.shape
            m = m.reshape(1, C, H // 2, 2, W // 2, 2).mean(axis=(3, 5))
            planes.append(m)
        return planes

    def _build_caches(self):
        C = self.feature_size
        flat = jnp.transpose(self.mat.reshape(C, -1))             # (G, C)
        self._plane_slab, self._tk_plane, self._res_plane = _prep_slab(flat, C)
        pool = jnp.concatenate(
            [jnp.transpose(p.reshape(C, -1)) for p in self._mip_planes()],
            axis=0)                                               # (total, C)
        self._pool_slab, self._tk_pool, self._res_pool = _prep_slab(pool, C)

    def create_mip(self):
        """API parity with the PyTorch module: (C, offsets[-1]) f32 pool."""
        return jnp.concatenate(
            [p.reshape(self.feature_size, -1) for p in self._mip_planes()],
            axis=1)

    def __call__(self, x, r=None):
        if r is None:
            return fetch_2d_pallas(x, self._plane_slab, res=self.res,
                                   feature_size=self.feature_size,
                                   tk=self._tk_plane,
                                   resident=self._res_plane, tb=self.tb)
        if x.shape[0] == 0:
            return jnp.zeros((0, self.n_output_dims), jnp.float32)
        return fetch_mip_2d_pallas(x, r, self._pool_slab,
                                   offsets=self.offsets, res=self.res,
                                   level=self.level,
                                   feature_size=self.feature_size,
                                   tk=self._tk_pool,
                                   resident=self._res_pool, tb=self.tb)


# ---------------------------------------------------------------------------
# Pure-JAX references (f32) for validation
# ---------------------------------------------------------------------------
def _ref_fetch_2d(x, plane, res):
    """plane: (C, res, res); x: (B, 2) -> (B, C)."""
    u = jnp.clip(x[:, 0] * res - 0.5, 0.0, res - 1.0)
    v = jnp.clip(x[:, 1] * res - 0.5, 0.0, res - 1.0)
    x0 = jnp.floor(u).astype(jnp.int32)
    y0 = jnp.floor(v).astype(jnp.int32)
    x1 = jnp.minimum(x0 + 1, res - 1)
    y1 = jnp.minimum(y0 + 1, res - 1)
    fu = (u - x0)[:, None]
    fv = (v - y0)[:, None]
    g = lambda iy, ix: plane[:, iy, ix].T
    return (g(y0, x0) * (1 - fu) * (1 - fv) + g(y0, x1) * fu * (1 - fv)
            + g(y1, x0) * (1 - fu) * fv + g(y1, x1) * fu * fv)


def _ref_fetch_mip_2d(x, r, planes, res, level):
    li = jnp.clip(jnp.log2(2.0 * r * res), 0.0, float(level - 1))
    l0 = jnp.floor(li)
    wl = (li - l0)[:, None]
    l0i = l0.astype(jnp.int32)[:, None]
    l1i = jnp.minimum(l0i + 1, level - 1)
    out = jnp.zeros((x.shape[0], planes[0].shape[1]), jnp.float32)
    for lv in range(level):
        f = _ref_fetch_2d(x, planes[lv][0], res // 2 ** lv)
        alpha = (jnp.where(l0i == lv, 1.0 - wl, 0.0)
                 + jnp.where(l1i == lv, wl, 0.0))
        out = out + alpha * f
    return out


if __name__ == "__main__":
    feature_size, res, level = 32, 16, 3
    B = 8

    enc = PlaneEncoding(feature_size, res, level, key=jax.random.PRNGKey(1))

    key = jax.random.PRNGKey(0)
    kx, kr = jax.random.split(key)
    x = jax.random.uniform(kx, (B, 2), jnp.float32)              # positions
    r = jax.random.uniform(kr, (B,), jnp.float32,
                           minval=1.0 / (2.0 * res), maxval=0.5)  # footprints

    f_nomip = enc(x)          # fetch_2d path (resident slab)
    f_mip = enc(x, r)         # fetch_mip_2d path (resident slab)
    jax.block_until_ready((f_nomip, f_mip))

    assert f_nomip.shape == (B, feature_size)
    assert f_mip.shape == (B, feature_size)
    assert bool(jnp.all(jnp.isfinite(f_nomip)))
    assert bool(jnp.all(jnp.isfinite(f_mip)))

    # Validate against f32 references (kernel uses bf16 operands -> ~1e-3 abs).
    ref_nomip = _ref_fetch_2d(x, enc.mat[0], res)
    ref_mip = _ref_fetch_mip_2d(x, r, enc._mip_planes(), res, level)
    assert float(jnp.max(jnp.abs(f_nomip - ref_nomip))) < 2e-2
    assert float(jnp.max(jnp.abs(f_mip - ref_mip))) < 2e-2

    # Also exercise the streamed (large-plane) fallback path for coverage.
    f_nomip_s = fetch_2d_pallas(x, enc._plane_slab, res=res,
                                feature_size=feature_size,
                                tk=enc._tk_plane, resident=False)
    f_mip_s = fetch_mip_2d_pallas(x, r, enc._pool_slab, offsets=enc.offsets,
                                  res=res, level=level,
                                  feature_size=feature_size,
                                  tk=enc._tk_pool, resident=False)
    jax.block_until_ready((f_nomip_s, f_mip_s))
    assert float(jnp.max(jnp.abs(f_nomip_s - ref_nomip))) < 2e-2
    assert float(jnp.max(jnp.abs(f_mip_s - ref_mip))) < 2e-2

    print("KERNEL_OK")
</pallas_src>

<mosaic_0001>
module attributes {stable_mosaic.version = 11 : i64} {
  func.func @_fetch2d_resident_kernel(%arg0: i32, %arg1: memref<128x2xf32, #tpu.memory_space<vmem>>, %arg2: memref<256x128xbf16, #tpu.memory_space<vmem>>, %arg3: memref<128x128xf32, #tpu.memory_space<vmem>>) attributes {dimension_semantics = [#tpu.dimension_semantics<parallel>], iteration_bounds = array<i64: 1>, scalar_prefetch = 0 : i64, scratch_operands = 0 : i64, tpu.core_type = #tpu.core_type<tc>, window_params = [{transform_indices = @transform_0, window_bounds = array<i64: 128, 2>}, {pipeline_mode = #tpu.pipeline_mode<synchronous>, transform_indices = @transform_1, window_bounds = array<i64: 256, 128>}, {transform_indices = @transform_2, window_bounds = array<i64: 128, 128>}]} {
    %c0 = arith.constant 0 : index
    %c0_0 = arith.constant 0 : index
    %0 = vector.load %arg1[%c0, %c0_0] : memref<128x2xf32, #tpu.memory_space<vmem>>, vector<128x2xf32>
    %cst = arith.constant 0.000000e+00 : f32
    %1 = vector.broadcast %cst : f32 to vector<128x128xf32>
    %2 = tpu.iota {dimensions = array<i32: 1>} : vector<1x256xi32>
    %c0_i32 = arith.constant 0 : i32
    %3 = vector.broadcast %c0_i32 : i32 to vector<1x256xi32>
    %4 = arith.addi %2, %3 : vector<1x256xi32>
    %c0_i32_1 = arith.constant 0 : i32
    %5 = vector.broadcast %c0_i32_1 : i32 to vector<1x256xi32>
    %6 = arith.subi %4, %5 : vector<1x256xi32>
    %c15_i32 = arith.constant 15 : i32
    %7 = vector.broadcast %c15_i32 : i32 to vector<1x256xi32>
    %8 = arith.andi %6, %7 : vector<1x256xi32>
    %9 = arith.sitofp %8 : vector<1x256xi32> to vector<1x256xf32>
    %c4_i32 = arith.constant 4 : i32
    %10 = vector.broadcast %c4_i32 : i32 to vector<1x256xi32>
    %11 = arith.shrsi %6, %10 : vector<1x256xi32>
    %12 = arith.sitofp %11 : vector<1x256xi32> to vector<1x256xf32>
    %13 = vector.extract_strided_slice %0 {offsets = [0, 0], sizes = [128, 1], strides = [1, 1]} : vector<128x2xf32> to vector<128x1xf32>
    %cst_2 = arith.constant 1.600000e+01 : f32
    %14 = vector.broadcast %cst_2 : f32 to vector<128x1xf32>
    %15 = arith.mulf %13, %14 : vector<128x1xf32>
    %cst_3 = arith.constant 5.000000e-01 : f32
    %16 = vector.broadcast %cst_3 : f32 to vector<128x1xf32>
    %17 = arith.subf %15, %16 : vector<128x1xf32>
    %cst_4 = arith.constant 0.000000e+00 : f32
    %cst_5 = arith.constant 1.500000e+01 : f32
    %18 = vector.broadcast %cst_4 : f32 to vector<128x1xf32>
    %19 = arith.maximumf %18, %17 : vector<128x1xf32>
    %20 = vector.broadcast %cst_5 : f32 to vector<128x1xf32>
    %21 = arith.minimumf %20, %19 : vector<128x1xf32>
    %22 = vector.extract_strided_slice %0 {offsets = [0, 1], sizes = [128, 1], strides = [1, 1]} : vector<128x2xf32> to vector<128x1xf32>
    %cst_6 = arith.constant 1.600000e+01 : f32
    %23 = vector.broadcast %cst_6 : f32 to vector<128x1xf32>
    %24 = arith.mulf %22, %23 : vector<128x1xf32>
    %cst_7 = arith.constant 5.000000e-01 : f32
    %25 = vector.broadcast %cst_7 : f32 to vector<128x1xf32>
    %26 = arith.subf %24, %25 : vector<128x1xf32>
    %cst_8 = arith.constant 0.000000e+00 : f32
    %cst_9 = arith.constant 1.500000e+01 : f32
    %27 = vector.broadcast %cst_8 : f32 to vector<128x1xf32>
    %28 = arith.maximumf %27, %26 : vector<128x1xf32>
    %29 = vector.broadcast %cst_9 : f32 to vector<128x1xf32>
    %30 = arith.minimumf %29, %28 : vector<128x1xf32>
    %31 = vector.broadcast %21 : vector<128x1xf32> to vector<128x256xf32>
    %32 = vector.broadcast %9 : vector<1x256xf32> to vector<128x256xf32>
    %33 = arith.subf %31, %32 : vector<128x256xf32>
    %34 = math.absf %33 : vector<128x256xf32>
    %cst_10 = arith.constant 1.000000e+00 : f32
    %35 = vector.broadcast %cst_10 : f32 to vector<128x256xf32>
    %36 = arith.subf %35, %34 : vector<128x256xf32>
    %cst_11 = arith.constant 0.000000e+00 : f32
    %37 = vector.broadcast %cst_11 : f32 to vector<128x256xf32>
    %38 = arith.maximumf %37, %36 : vector<128x256xf32>
    %39 = vector.broadcast %30 : vector<128x1xf32> to vector<128x256xf32>
    %40 = vector.broadcast %12 : vector<1x256xf32> to vector<128x256xf32>
    %41 = arith.subf %39, %40 : vector<128x256xf32>
    %42 = math.absf %41 : vector<128x256xf32>
    %cst_12 = arith.constant 1.000000e+00 : f32
    %43 = vector.broadcast %cst_12 : f32 to vector<128x256xf32>
    %44 = arith.subf %43, %42 : vector<128x256xf32>
    %cst_13 = arith.constant 0.000000e+00 : f32
    %45 = vector.broadcast %cst_13 : f32 to vector<128x256xf32>
    %46 = arith.maximumf %45, %44 : vector<128x256xf32>
    %47 = arith.mulf %38, %46 : vector<128x256xf32>
    %48 = arith.truncf %47 : vector<128x256xf32> to vector<128x256xbf16>
    %c0_14 = arith.constant 0 : index
    %c0_15 = arith.constant 0 : index
    %49 = vector.load %arg2[%c0_14, %c0_15] : memref<256x128xbf16, #tpu.memory_space<vmem>>, vector<256x128xbf16>
    %cst_16 = arith.constant dense<0.000000e+00> : vector<128x128xf32>
    %50 = tpu.matmul %48, %49, %cst_16 {dimension_numbers = #tpu.dot_dimension_numbers<[1], [0], [0], [1], [0, 0, 1, 1], [], []>} : vector<128x256xbf16>, vector<256x128xbf16>, vector<128x128xf32> -> vector<128x128xf32>
    %51 = arith.addf %1, %50 : vector<128x128xf32>
    %c0_17 = arith.constant 0 : index
    %c0_18 = arith.constant 0 : index
    %52 = vector.load %arg3[%c0_17, %c0_18] : memref<128x128xf32, #tpu.memory_space<vmem>>, vector<128x128xf32>
    tpu.vector_store %arg3[%c0_17, %c0_18], %51 {strides = array<i32>} : memref<128x128xf32, #tpu.memory_space<vmem>>, vector<128x128xf32>,
    return
  }
  func.func @transform_0(%arg0: i32) -> (i32, i32) {
    %c0_i32 = arith.constant 0 : i32
    %c0_i32_0 = arith.constant 0 : i32
    return %arg0, %c0_i32 : i32, i32
  }
  func.func @transform_1(%arg0: i32) -> (i32, i32) {
    %c0_i32 = arith.constant 0 : i32
    %c0_i32_0 = arith.constant 0 : i32
    %c0_i32_1 = arith.constant 0 : i32
    return %c0_i32, %c0_i32_0 : i32, i32
  }
  func.func @transform_2(%arg0: i32) -> (i32, i32) {
    %c0_i32 = arith.constant 0 : i32
    %c0_i32_0 = arith.constant 0 : i32
    return %arg0, %c0_i32 : i32, i32
  }
}

</mosaic_0001>

<bundles_post_ra>
// kernel: tpu_custom_call.1
= control target key start
LH: loop header
LB: loop body
LE: loop exit
PB: predicated region body
PF: predicated region fallthrough
CT: control target
= control target key end

     0   :  { %v976_v3 = vmov 0   ;;  %v977_v44 = vmov 1   ;;  %s1279_s0 = inlined_call_operand.vmem [shape: f32[128,2], index: 0, kind: input, shape index: {}]   ;;  %s1280_s1 = inlined_call_operand.vmem [shape: bf16[256,128], index: 1, kind: input, shape index: {}]   ;;  %s1281_s2 = inlined_call_operand.hbm [shape: f32[128,128], index: 2, kind: output, shape index: {}]  }
   0x1   :  { %v21_v0 = vld [vmem:[%s1279_s0 + $0x40] sm:$0xff]  ;;  %v22_v2 = vld [vmem:[%s1279_s0 + $0x48] sm:$0xff]  ;;  %927 = vset.pattern.permute.xlu1 %v976_v3  ;;  %926 = vset.pattern.permute.xlu0 %v976_v3  ;;  %v16_v8 = vld [vmem:[%s1279_s0 + $0x18] sm:$0xff] }
   0x2   :  { %v13_v1 = vld [vmem:[%s1279_s0] sm:$0xff]  ;;  %v48_v4 = vmul.f32 16.0, %v21_v0  ;;  %v49_v6 = vmul.f32 16.0, %v22_v2  ;;  %v14_v7 = vld [vmem:[%s1279_s0 + $0x8] sm:$0xff]  ;;  %v43_v11 = vmul.f32 16.0, %v16_v8  ;;  %v20_v21 = vld [vmem:[%s1279_s0 + $0x38] sm:$0xff] }
   0x3   :  { %v40_v5 = vmul.f32 16.0, %v13_v1  ;;  %v18_v9 = vld [vmem:[%s1279_s0 + $0x28] sm:$0xff]  ;;  %v41_v10 = vmul.f32 16.0, %v14_v7  ;;  %v15_v23 = vld [vmem:[%s1279_s0 + $0x10] sm:$0xff]  ;;  %v47_v27 = vmul.f32 16.0, %v20_v21  ;;  %v936_v32 = vld [vmem:[%s1280_s1 + $0x40] sm:$0xff]  }
   0x4   :  { %v817_v12 = vadd.f32 -0.5, %v48_v4  ;;  %v818_v14 = vadd.f32 -0.5, %v49_v6  ;;  %v45_v16 = vmul.f32 16.0, %v18_v9  ;;  %v812_v20 = vadd.f32 -0.5, %v43_v11  ;;  %841 = vmatprep.subr.bf16.mxu0 %v936_v32  ;;  %905 = vmatprep.subr.bf16.mxu1 %v936_v32  ;;  %v23_v34 = vld [vmem:[%s1279_s0 + $0x50] sm:$0xff]  ;;  %v937_v35 = vld [vmem:[%s1280_s1] sm:$0xff]  }
   0x5   :  { %v809_v13 = vadd.f32 -0.5, %v40_v5  ;;  %v810_v15 = vadd.f32 -0.5, %v41_v10  ;;  %v42_v31 = vmul.f32 16.0, %v15_v23  ;;  %v816_v33 = vadd.f32 -0.5, %v47_v27  ;;  %842 = vmatpush3.bf16.msra.mxu0 %v937_v35  ;;  %913 = vmatpush3.bf16.msra.mxu1 %v937_v35  ;;  %v24_v40 = vld [vmem:[%s1279_s0 + $0x58] sm:$0xff]  ;;  %v938_v41 = vld [vmem:[%s1280_s1 + $0x48] sm:$0xff]  }
   0x6   :  { %v80_v17 = vmax.f32 %v817_v12, 0.0  ;;  %v81_v19 = vmax.f32 %v818_v14, 0.0  ;;  %v814_v26 = vadd.f32 -0.5, %v45_v16  ;;  %v75_v30 = vmax.f32 %v812_v20, 0.0  ;;  %v939_v42 = vld [vmem:[%s1280_s1 + $0x8] sm:$0xff]   ;;  %843 = vmatprep.subr.bf16.mxu0 %v938_v41  ;;  %v940_v48 = vld [vmem:[%s1280_s1 + $0x50] sm:$0xff]   ;;  %906 = vmatprep.subr.bf16.mxu1 %v938_v41 }
   0x7   :  { %v72_v18 = vmax.f32 %v809_v13, 0.0  ;;  %v73_v22 = vmax.f32 %v810_v15, 0.0  ;;  %v811_v38 = vadd.f32 -0.5, %v42_v31  ;;  %v50_v39 = vmul.f32 16.0, %v23_v34  ;;  %v941_v50 = vld [vmem:[%s1280_s1 + $0x10] sm:$0xff]   ;;  %v942_v54 = vld [vmem:[%s1280_s1 + $0x58] sm:$0xff]  }
   0x8   :  { %v96_v24 = vmin.f32 %v80_v17, 15.0  ;;  %v1025_v28 = vmin.f32 %v81_v19, 15.0  ;;  %v1037_v36 = vmin.f32 %v75_v30, 15.0  ;;  %v77_v37 = vmax.f32 %v814_v26, 0.0  ;;  %v943_v56 = vld [vmem:[%s1280_s1 + $0x18] sm:$0xff]   ;;  %v17_v57 = vld [vmem:[%s1279_s0 + $0x20] sm:$0xff] }
   0x9   :  { %v1022_v25 = vmin.f32 %v72_v18, 15.0  ;;  %v89_v29 = vmin.f32 %v73_v22, 15.0  ;;  %v79_v43 = vmax.f32 %v816_v33, 0.0  ;;  %v74_v46 = vmax.f32 %v811_v38, 0.0  ;;  %844 = vmatpush3.bf16.msra.mxu0 %v939_v42  ;;  %914 = vmatpush3.bf16.msra.mxu1 %v939_v42  ;;  %v944_v59 = vld [vmem:[%s1280_s1 + $0x60] sm:$0xff]  }
   0xa   :  { %146 = vperm.xlu1 %927, %v96_v24   ;;  %v1050_v45 = vmin.f32 %v77_v37, 15.0  ;;  %v51_v47 = vmul.f32 16.0, %v24_v40  ;;  %v819_v49 = vadd.f32 -0.5, %v50_v39  ;;  %845 = vmatprep.subr.bf16.mxu0 %v940_v48  ;;  %v945_v61 = vld [vmem:[%s1280_s1 + $0x20] sm:$0xff]  }
   0xb   :  { %106 = vperm.xlu0 %926, %v1022_v25   ;;  %v1059_v51 = vmin.f32 %v79_v43, 15.0  ;;  %v90_v52 = vmin.f32 %v74_v46, 15.0  ;;  %907 = vmatprep.subr.bf16.mxu1 %v940_v48 }
   0xc   :  { %v820_v53 = vadd.f32 -0.5, %v51_v47  ;;  %v82_v55 = vmax.f32 %v819_v49, 0.0 }
   0xd   :  { %846 = vmatpush3.bf16.msra.mxu0 %v941_v50  ;;  %915 = vmatpush3.bf16.msra.mxu1 %v941_v50 }
   0xe   :  { %151 = vperm.xlu1 %927, %v1025_v28   ;;  %847 = vmatprep.subr.bf16.mxu0 %v942_v54  ;;  %v83_v58 = vmax.f32 %v820_v53, 0.0  ;;  %v98_v60 = vmin.f32 %v82_v55, 15.0 }
   0xf   :  { %111 = vperm.xlu0 %926, %v89_v29   ;;  %908 = vmatprep.subr.bf16.mxu1 %v942_v54 }
  0x11   :  { %848 = vmatpush3.bf16.msra.mxu0 %v943_v56  ;;  %916 = vmatpush3.bf16.msra.mxu1 %v943_v56 }
  0x12   :  { %928 = vset.pattern.permute.xlu1 %v977_v44  ;;  %849 = vmatprep.subr.bf16.mxu0 %v944_v59 }
  0x13   :  { %121 = vperm.xlu0 %926, %v1037_v36   ;;  %317 = vperm.xlu1 %928, %v89_v29  }
  0x17   :  { %131 = vperm.xlu0 %926, %v1050_v45   ;;  %345 = vperm.xlu1 %928, %v96_v24  }
  0x1b   :  { %141 = vperm.xlu0 %926, %v1059_v51   ;;  %929 = vset.pattern.permute.xlu1 %v976_v3 }
  0x1c   :  { %116 = vperm.xlu1 %929, %v90_v52  }
  0x1d   :  { %7 = vsyncpa [#allocation3], 0  ;;  %909 = vmatprep.subr.bf16.mxu1 %v944_v59  ;;  %v44_v62 = vmul.f32 16.0, %v17_v57  ;;  %v946_v63 = vld [vmem:[%s1280_s1 + $0x68] sm:$0xff]   ;;  %v99_v0 = vmin.f32 %v83_v58, 15.0  ;;  %850 = vmatpush3.bf16.msra.mxu0 %v945_v61  ;;  %v25_v6 = vld [vmem:[%s1279_s0 + $0x60] sm:$0xff]  ;;  %v29_v35 = vlaneseq }
  0x1e   :  { %v26_v1 = vld [vmem:[%s1279_s0 + $0x68] sm:$0xff]  ;;  %851 = vmatprep.subr.bf16.mxu0 %v946_v63  ;;  %917 = vmatpush3.bf16.msra.mxu1 %v945_v61  ;;  %v948_v7 = vld [vmem:[%s1280_s1 + $0x70] sm:$0xff]   ;;  %v52_v10 = vmul.f32 16.0, %v25_v6  ;;  %v950_v14 = vld [vmem:[%s1280_s1 + $0x78] sm:$0xff]  }
  0x1f   :  { %934 = vset.pattern.permute.xlu0 %v977_v44  ;;  %v947_v2 = vld [vmem:[%s1280_s1 + $0x28] sm:$0xff]   ;;  %910 = vmatprep.subr.bf16.mxu1 %v946_v63  ;;  %v813_v4 = vadd.f32 -0.5, %v44_v62  ;;  %v53_v5 = vmul.f32 16.0, %v26_v1  ;;  %v19_v8 = vld [vmem:[%s1279_s0 + $0x30] sm:$0xff]  ;;  %v28_v15 = vld [vmem:[%s1279_s0 + $0x78] sm:$0xff] }
  0x20   :  { %313 = vperm.xlu0 %934, %v1022_v25   ;;  %156 = vperm.xlu1 %929, %v98_v60   ;;  %v949_v9 = vld [vmem:[%s1280_s1 + $0x30] sm:$0xff]   ;;  %v46_v13 = vmul.f32 16.0, %v19_v8  ;;  %v951_v16 = vld [vmem:[%s1280_s1 + $0x38] sm:$0xff]   ;;  %v821_v17 = vadd.f32 -0.5, %v52_v10  ;;  %v55_v21 = vmul.f32 16.0, %v28_v15 }
  0x21   :  { %852 = vmatpush3.bf16.msra.mxu0 %v947_v2  ;;  %v76_v11 = vmax.f32 %v813_v4, 0.0  ;;  %v822_v12 = vadd.f32 -0.5, %v53_v5  ;;  %v27_v30 = vld [vmem:[%s1279_s0 + $0x70] sm:$0xff]  ;;  %s978_s0 = smov [#allocation2]  }
  0x22   :  { %853 = vmatprep.subr.bf16.mxu0 %v948_v7  ;;  %918 = vmatpush3.bf16.msra.mxu1 %v947_v2  ;;  %v815_v20 = vadd.f32 -0.5, %v46_v13  ;;  %v84_v22 = vmax.f32 %v821_v17, 0.0  ;;  %v824_v25 = vadd.f32 -0.5, %v55_v21  ;;  %v54_v31 = vmul.f32 16.0, %v27_v30  ;;  %s798_s16 = sshll.u32 %s978_s0, 4  ;;  %s799_s16 = int_to_ptr.vmem [resolvable:$true] %s798_s16 }
  0x23   :  { %911 = vmatprep.subr.bf16.mxu1 %v948_v7  ;;  %v92_v18 = vmin.f32 %v76_v11, 15.0  ;;  %v85_v19 = vmax.f32 %v822_v12, 0.0  ;;  %s952_s17 = scalar_lea.vmem %s799_s16, 2048  ;;  %p957_p1 = scmp.lt.s32.totalorder %s799_s16, %s799_s16 }
  0x24   :  { %349 = vperm.xlu0 %934, %v1025_v28   ;;  %161 = vperm.xlu1 %929, %v99_v0   ;;  %v78_v24 = vmax.f32 %v815_v20, 0.0  ;;  %v100_v26 = vmin.f32 %v84_v22, 15.0  ;;  %v87_v28 = vmax.f32 %v824_v25, 0.0  ;;  %v823_v32 = vadd.f32 -0.5, %v54_v31  ;;  %p953_p0 = scmp.ne.s32.totalorder %s799_s16, %s952_s17  ;;  %p958_p2 = scmp.lt.s32.totalorder %s952_s17, %s952_s17 }
  0x25   :  { %854 = vmatpush3.bf16.msra.mxu0 %v949_v9  ;;  %v101_v23 = vmin.f32 %v85_v19, 15.0 }
  0x26   :  { %855 = vmatprep.subr.bf16.mxu0 %v950_v14  ;;  %919 = vmatpush3.bf16.msra.mxu1 %v949_v9  ;;  %v94_v27 = vmin.f32 %v78_v24, 15.0  ;;  %v103_v29 = vmin.f32 %v87_v28, 15.0  ;;  %v86_v33 = vmax.f32 %v823_v32, 0.0  ;;  %p959_p3 = por %p958_p2, %p957_p1 }
  0x27   :  { %912 = vmatprep.subr.bf16.mxu1 %v950_v14 }
  0x28   :  { %321 = vperm.xlu0 %934, %v90_v52   ;;  %930 = vset.pattern.permute.xlu1 %v977_v44  ;;  %v102_v34 = vmin.f32 %v86_v33, 15.0  ;;  %p960_p4 = pnand %p959_p3, %p953_p0 }
  0x29   :  { %325 = vperm.xlu1 %930, %v1037_v36   ;;  %856 = vmatpush3.bf16.msra.mxu0 %v951_v16  ;;  %v30_v36 = vand.u32 127, %v29_v35 }
  0x2a   :  { %920 = vmatpush3.bf16.msra.mxu1 %v951_v16 }
  0x2b   :  { %v31_v37 = vadd.s32 128, %v30_v36  ;;  %v32_v38 = vand.u32 15, %v30_v36  ;;  %v36_v46 = vshra.s32 %v30_v36, 4 }
  0x2c   :  { %357 = vperm.xlu0 %934, %v99_v0  }
  0x2d   :  { %353 = vperm.xlu1 %930, %v98_v60   ;;  %v33_v39 = vand.u32 15, %v31_v37  ;;  %v1122_v42 = vcvt.s32.f32 %v32_v38  ;;  %v37_v47 = vshra.s32 %v31_v37, 4 }
  0x2f   :  { %v1124_v43 = vcvt.s32.f32 %v33_v39  ;;  %v1133_v54 = vcvt.s32.f32 %v37_v47 }
  0x30   :  { %329 = vperm.xlu0 %934, %v92_v18  }
  0x31   :  { %931 = vset.pattern.permute.xlu1 %v976_v3 }
  0x32   :  { %126 = vperm.xlu1 %931, %v92_v18  }
  0x34   :  { %365 = vperm.xlu0 %934, %v101_v23  }
  0x36   :  { %166 = vperm.xlu1 %931, %v100_v26  }
  0x38   :  { %337 = vperm.xlu0 %934, %v94_v27  }
  0x3a   :  { %171 = vperm.xlu1 %931, %v101_v23  }
  0x3c   :  { %373 = vperm.xlu0 %934, %v103_v29  }
  0x3e   :  { %932 = vset.pattern.permute.xlu1 %v977_v44 }
  0x3f   :  { %333 = vperm.xlu1 %932, %v1050_v45  }
  0x43   :  { %361 = vperm.xlu1 %932, %v100_v26  }
  0x47   :  { %933 = vset.pattern.permute.xlu1 %v976_v3 }
  0x48   :  { %136 = vperm.xlu1 %933, %v94_v27  }
  0x4c   :  { %176 = vperm.xlu1 %933, %v102_v34  }
  0x50   :  { %181 = vperm.xlu1 %933, %v103_v29  }
  0x54   :  { %935 = vset.pattern.permute.xlu1 %v977_v44 }
  0x55   :  { %341 = vperm.xlu1 %935, %v1059_v51   ;;  %v1130_v51 = vcvt.s32.f32 %v36_v46 }
  0x59   :  { %369 = vperm.xlu1 %935, %v102_v34  }
  0x89   :  { %v147_v40 = vpop.permute.xlu1 %146 }
  0x8a   :  { %v107_v41 = vpop.permute.xlu0 %106  ;;  %v200_v44 = vsub.f32 %v147_v40, %v1122_v42  ;;  %v201_v48 = vsub.f32 %v147_v40, %v1124_v43 }
  0x8b   :  { %v184_v49 = vsub.f32 %v107_v41, %v1122_v42  ;;  %v185_v50 = vsub.f32 %v107_v41, %v1124_v43 }
  0x8c   :  { %v232_v56 = vand.u32 2147483647, %v200_v44  ;;  %v233_v57 = vand.u32 2147483647, %v201_v48 }
  0x8d   :  { %v152_v3 = vpop.permute.xlu1 %151  ;;  %v216_v58 = vand.u32 2147483647, %v184_v49  ;;  %v217_v59 = vand.u32 2147483647, %v185_v50 }
  0x8e   :  { %v112_v45 = vpop.permute.xlu0 %111  ;;  %v202_v53 = vsub.f32 %v152_v3, %v1122_v42  ;;  %v203_v60 = vsub.f32 %v152_v3, %v1124_v43  ;;  %v264_v7 = vsub.f32 1.0, %v232_v56  ;;  %v265_v8 = vsub.f32 1.0, %v233_v57 }
  0x8f   :  { %v186_v61 = vsub.f32 %v112_v45, %v1122_v42  ;;  %v187_v62 = vsub.f32 %v112_v45, %v1124_v43  ;;  %v248_v9 = vsub.f32 1.0, %v216_v58  ;;  %v249_v10 = vsub.f32 1.0, %v217_v59 }
  0x90   :  { %v234_v2 = vand.u32 2147483647, %v202_v53  ;;  %v235_v11 = vand.u32 2147483647, %v203_v60  ;;  %v1145_v21 = vmax.f32 %v264_v7, 0.0  ;;  %v1149_v25 = vmax.f32 %v265_v8, 0.0 }
  0x91   :  { %v218_v12 = vand.u32 2147483647, %v186_v61  ;;  %v219_v13 = vand.u32 2147483647, %v187_v62  ;;  %v1151_v26 = vmax.f32 %v248_v9, 0.0  ;;  %v1153_v29 = vmax.f32 %v249_v10, 0.0 }
  0x92   :  { %v122_v52 = vpop.permute.xlu0 %121  ;;  %v318_v55 = vpop.permute.xlu1 %317  ;;  %v266_v17 = vsub.f32 1.0, %v234_v2  ;;  %v267_v27 = vsub.f32 1.0, %v235_v11 }
  0x93   :  { %v378_v63 = vsub.f32 %v318_v55, %v1130_v51  ;;  %v190_v0 = vsub.f32 %v122_v52, %v1122_v42  ;;  %v379_v4 = vsub.f32 %v318_v55, %v1133_v54  ;;  %v191_v5 = vsub.f32 %v122_v52, %v1124_v43 }
  0x94   :  { %v250_v28 = vsub.f32 1.0, %v218_v12  ;;  %v251_v30 = vsub.f32 1.0, %v219_v13  ;;  %v1155_v33 = vmax.f32 %v266_v17, 0.0  ;;  %v1161_v45 = vmax.f32 %v267_v27, 0.0 }
  0x95   :  { %v410_v14 = vand.u32 2147483647, %v378_v63  ;;  %v222_v15 = vand.u32 2147483647, %v190_v0  ;;  %v411_v18 = vand.u32 2147483647, %v379_v4 }
  0x96   :  { %v132_v1 = vpop.permute.xlu0 %131  ;;  %v346_v6 = vpop.permute.xlu1 %345  ;;  %v223_v19 = vand.u32 2147483647, %v191_v5  ;;  %v282_v46 = vmax.f32 %v250_v28, 0.0  ;;  %v283_v48 = vmax.f32 %v251_v30, 0.0 }
  0x97   :  { %v392_v20 = vsub.f32 %v346_v6, %v1130_v51  ;;  %v393_v22 = vsub.f32 %v346_v6, %v1133_v54  ;;  %v194_v23 = vsub.f32 %v132_v1, %v1122_v42  ;;  %v442_v31 = vsub.f32 1.0, %v410_v14 }
  0x98   :  { %v254_v32 = vsub.f32 1.0, %v222_v15  ;;  %v443_v34 = vsub.f32 1.0, %v411_v18  ;;  %v255_v35 = vsub.f32 1.0, %v223_v19  ;;  %v195_v39 = vsub.f32 %v132_v1, %v1124_v43 }
  0x99   :  { %v424_v36 = vand.u32 2147483647, %v392_v20  ;;  %v425_v38 = vand.u32 2147483647, %v393_v22  ;;  %v1158_v40 = vand.u32 2147483647, %v194_v23 }
  0x9a   :  { %v1142_v16 = vpop.permute.xlu0 %141  ;;  %v474_v49 = vmax.f32 %v442_v31, 0.0  ;;  %v1165_v50 = vmax.f32 %v254_v32, 0.0  ;;  %v1168_v53 = vmax.f32 %v255_v35, 0.0  ;;  %v475_v59 = vmax.f32 %v443_v34, 0.0 }
  0x9b   :  { %v117_v24 = vpop.permute.xlu1 %116  ;;  %v456_v55 = vsub.f32 1.0, %v424_v36  ;;  %v457_v60 = vsub.f32 1.0, %v425_v38  ;;  %v1170_v61 = vand.u32 2147483647, %v195_v39  ;;  %v258_v62 = vsub.f32 1.0, %v1158_v40 }
  0x9c   :  { %v188_v47 = vsub.f32 %v117_v24, %v1122_v42  ;;  %v189_v52 = vsub.f32 %v117_v24, %v1124_v43  ;;  %v1177_v5 = vmul.f32 %v474_v49, %v282_v46  ;;  %v198_v6 = vsub.f32 %v1142_v16, %v1122_v42 }
  0x9d   :  { %v199_v7 = vsub.f32 %v1142_v16, %v1124_v43  ;;  %v488_v9 = vmax.f32 %v456_v55, 0.0  ;;  %v489_v14 = vmax.f32 %v457_v60, 0.0  ;;  %v259_v15 = vsub.f32 1.0, %v1170_v61 }
  0x9e   :  { %v220_v0 = vand.u32 2147483647, %v188_v47  ;;  %v1183_v8 = vand.u32 2147483647, %v189_v52  ;;  %v507_v18 = vmul.f32 %v475_v59, %v283_v48 }
  0x9f   :  { %v314_v37 = vpop.permute.xlu0 %313  ;;  %v157_v3 = vpop.permute.xlu1 %156  ;;  %v1193_v32 = vmul.f32 %v488_v9, %v1145_v21 }
  0xa0   :  { %v376_v41 = vsub.f32 %v314_v37, %v1130_v51  ;;  %v377_v44 = vsub.f32 %v314_v37, %v1133_v54  ;;  %v204_v17 = vsub.f32 %v157_v3, %v1122_v42  ;;  %v252_v19 = vsub.f32 1.0, %v220_v0 }
  0xa1   :  { %v205_v22 = vsub.f32 %v157_v3, %v1124_v43  ;;  %v253_v34 = vsub.f32 1.0, %v1183_v8  ;;  %v521_v3 = vmul.f32 %v489_v14, %v1149_v25 }
  0xa2   :  { %v408_v56 = vand.u32 2147483647, %v376_v41  ;;  %v409_v57 = vand.u32 2147483647, %v377_v44  ;;  %v236_v38 = vand.u32 2147483647, %v204_v17 }
  0xa3   :  { %v350_v58 = vpop.permute.xlu0 %349  ;;  %v1173_v63 = vpop.permute.xlu1 %161  ;;  %v1197_v46 = vmax.f32 %v252_v19, 0.0  ;;  %v237_v47 = vand.u32 2147483647, %v205_v22 }
  0xa4   :  { %v441_v1 = vsub.f32 1.0, %v409_v57  ;;  %v394_v2 = vsub.f32 %v350_v58, %v1130_v51  ;;  %v395_v4 = vsub.f32 %v350_v58, %v1133_v54  ;;  %v440_v10 = vsub.f32 1.0, %v408_v56 }
  0xa5   :  { %v206_v44 = vsub.f32 %v1173_v63, %v1122_v42  ;;  %v207_v0 = vsub.f32 %v1173_v63, %v1124_v43  ;;  %v269_v8 = vsub.f32 1.0, %v237_v47 }
  0xa6   :  { %v426_v11 = vand.u32 2147483647, %v394_v2  ;;  %v427_v12 = vand.u32 2147483647, %v395_v4  ;;  %v473_v20 = vmax.f32 %v441_v1, 0.0  ;;  %v472_v35 = vmax.f32 %v440_v10, 0.0 }
  0xa7   :  { %v322_v13 = vpop.permute.xlu0 %321  ;;  %v268_v4 = vsub.f32 1.0, %v236_v38 }
  0xa8   :  { %v458_v23 = vsub.f32 1.0, %v426_v11  ;;  %v326_v24 = vpop.permute.xlu1 %325  ;;  %v380_v27 = vsub.f32 %v322_v13, %v1130_v51  ;;  %v381_v28 = vsub.f32 %v322_v13, %v1133_v54  ;;  %v459_v36 = vsub.f32 1.0, %v427_v12 }
  0xa9   :  { %v382_v30 = vsub.f32 %v326_v24, %v1130_v51  ;;  %v383_v31 = vsub.f32 %v326_v24, %v1133_v54  ;;  %v505_v56 = vmul.f32 %v473_v20, %v1153_v29  ;;  %v504_v57 = vmul.f32 %v472_v35, %v1151_v26 }
  0xaa   :  { %v490_v39 = vmax.f32 %v458_v23, 0.0  ;;  %v412_v21 = vand.u32 2147483647, %v380_v27  ;;  %v413_v52 = vand.u32 2147483647, %v381_v28  ;;  %v491_v58 = vmax.f32 %v459_v36, 0.0 }
  0xab   :  { %v358_v37 = vpop.permute.xlu0 %357  ;;  %v415_v41 = vand.u32 2147483647, %v383_v31  ;;  %v414_v48 = vand.u32 2147483647, %v382_v30  ;;  %v537_v2 = vpack.c.bf16 %v507_v18, %v505_v56  ;;  %v238_v20 = vand.u32 2147483647, %v206_v44 }
  0xac   :  { %v354_v49 = vpop.permute.xlu1 %353  ;;  %v399_v55 = vsub.f32 %v358_v37, %v1133_v54  ;;  %v398_v59 = vsub.f32 %v358_v37, %v1130_v51  ;;  %v522_v60 = vmul.f32 %v490_v39, %v1155_v33  ;;  %v444_v29 = vsub.f32 1.0, %v412_v21 }
  0xad   :  { %v396_v25 = vsub.f32 %v354_v49, %v1130_v51  ;;  %v447_v1 = vsub.f32 1.0, %v415_v41  ;;  %v446_v9 = vsub.f32 1.0, %v414_v48  ;;  %v397_v10 = vsub.f32 %v354_v49, %v1133_v54  ;;  %712 = vmatprep.mubr.bf16.mxu0 %v537_v2 }
  0xae   :  { %v445_v11 = vsub.f32 1.0, %v413_v52  ;;  %v431_v26 = vand.u32 2147483647, %v399_v55  ;;  %v430_v14 = vand.u32 2147483647, %v398_v59  ;;  %v536_v33 = vpack.c.bf16 %v1177_v5, %v504_v57 }
  0xaf   :  { %v428_v12 = vand.u32 2147483647, %v396_v25  ;;  %v429_v17 = vand.u32 2147483647, %v397_v10  ;;  %v523_v19 = vmul.f32 %v491_v58, %v1161_v45  ;;  %v330_v63 = vpop.permute.xlu0 %329  ;;  %v239_v18 = vand.u32 2147483647, %v207_v0 }
  0xb0   :  { %v479_v22 = vmax.f32 %v447_v1, 0.0  ;;  %v544_v23 = vpack.c.bf16 %v522_v60, %v1193_v32  ;;  %v478_v24 = vmax.f32 %v446_v9, 0.0  ;;  %713 = vmatmul.mubr.bf16.vlgmr.msra.gmra.mrb[0].mxu0 %v536_v33  ;;  %v285_v31 = vmax.f32 %v253_v34, 0.0 }
  0xb1   :  { %v127_v13 = vpop.permute.xlu1 %126  ;;  %v460_v27 = vsub.f32 1.0, %v428_v12  ;;  %v461_v28 = vsub.f32 1.0, %v429_v17  ;;  %v545_v30 = vpack.c.bf16 %v523_v19, %v521_v3  ;;  %v300_v35 = vmax.f32 %v268_v4, 0.0 }
  0xb2   :  { %v477_v36 = vmax.f32 %v445_v11, 0.0  ;;  %v463_v37 = vsub.f32 1.0, %v431_v26  ;;  %v476_v5 = vmax.f32 %v444_v29, 0.0  ;;  %v462_v39 = vsub.f32 1.0, %v430_v14 }
  0xb3   :  { %744 = vmatprep.mubr.bf16.mxu1 %v545_v30  ;;  %v384_v45 = vsub.f32 %v330_v63, %v1130_v51  ;;  %v385_v41 = vsub.f32 %v330_v63, %v1133_v54  ;;  %v271_v47 = vsub.f32 1.0, %v239_v18  ;;  %v511_v32 = vmul.f32 %v479_v22, %v1168_v53  ;;  %v366_v52 = vpop.permute.xlu0 %365 }
  0xb4   :  { %v493_v44 = vmax.f32 %v461_v28, 0.0  ;;  %745 = vmatmul.mubr.bf16.vlgmr.msra.gmra.mrb[0].mxu1 %v544_v23  ;;  %v192_v3 = vsub.f32 %v127_v13, %v1122_v42  ;;  %v301_v34 = vmax.f32 %v269_v8, 0.0  ;;  %v270_v48 = vsub.f32 1.0, %v238_v20 }
  0xb5   :  { %v1213_v38 = vpop.permute.xlu1 %166  ;;  %v510_v49 = vmul.f32 %v478_v24, %v1165_v50  ;;  %v492_v21 = vmax.f32 %v460_v27, 0.0  ;;  %v509_v55 = vmul.f32 %v477_v36, %v285_v31  ;;  %v495_v56 = vmax.f32 %v463_v37, 0.0 }
  0xb6   :  { %v193_v57 = vsub.f32 %v127_v13, %v1124_v43  ;;  %v402_v58 = vsub.f32 %v366_v52, %v1130_v51  ;;  %v508_v25 = vmul.f32 %v476_v5, %v1197_v46  ;;  %v494_v53 = vmax.f32 %v462_v39, 0.0 }
  0xb7   :  { %v416_v60 = vand.u32 2147483647, %v384_v45  ;;  %v417_v0 = vand.u32 2147483647, %v385_v41  ;;  %v303_v1 = vmax.f32 %v271_v47, 0.0  ;;  %v525_v2 = vmul.f32 %v493_v44, %v301_v34 }
  0xb8   :  { %v224_v4 = vand.u32 2147483647, %v192_v3  ;;  %v539_v8 = vpack.c.bf16 %v511_v32, %v509_v55  ;;  %v1225_v50 = vmax.f32 %v258_v62, 0.0  ;;  %v302_v9 = vmax.f32 %v270_v48, 0.0 }
  0xb9   :  { %v172_v59 = vpop.permute.xlu1 %171  ;;  %v524_v10 = vmul.f32 %v492_v21, %v300_v35  ;;  %v538_v29 = vpack.c.bf16 %v510_v49, %v508_v25  ;;  %v527_v11 = vmul.f32 %v495_v56, %v303_v1  ;;  %v225_v26 = vand.u32 2147483647, %v193_v57 }
  0xba   :  { %v403_v12 = vsub.f32 %v366_v52, %v1133_v54  ;;  %v434_v13 = vand.u32 2147483647, %v402_v58  ;;  %720 = vmatprep.mubr.bf16.mxu0 %v539_v8  ;;  %v526_v46 = vmul.f32 %v494_v53, %v302_v9  ;;  %v448_v14 = vsub.f32 1.0, %v416_v60 }
  0xbb   :  { %v449_v17 = vsub.f32 1.0, %v417_v0  ;;  %721 = vmatmul.mubr.bf16.gmra.mrb[4].mxu0 %v538_v29  ;;  %v210_v33 = vsub.f32 %v172_v59, %v1122_v42  ;;  %v256_v63 = vsub.f32 1.0, %v224_v4  ;;  %v208_v40 = vsub.f32 %v1213_v38, %v1122_v42 }
  0xbc   :  { %v211_v62 = vsub.f32 %v172_v59, %v1124_v43  ;;  %v547_v20 = vpack.c.bf16 %v527_v11, %v525_v2  ;;  %v1235_v18 = vand.u32 2147483647, %v198_v6  ;;  %v1240_v22 = vand.u32 2147483647, %v199_v7  ;;  %v338_v59 = vpop.permute.xlu0 %337 }
  0xbd   :  { %v209_v23 = vsub.f32 %v1213_v38, %v1124_v43  ;;  %v546_v24 = vpack.c.bf16 %v526_v46, %v524_v10  ;;  %v291_v27 = vmax.f32 %v259_v15, 0.0  ;;  %v257_v28 = vsub.f32 1.0, %v225_v26 }
  0xbe   :  { %v334_v19 = vpop.permute.xlu1 %333  ;;  %v435_v30 = vand.u32 2147483647, %v403_v12  ;;  %v466_v31 = vsub.f32 1.0, %v434_v13  ;;  %752 = vmatprep.mubr.bf16.mxu1 %v547_v20  ;;  %v480_v35 = vmax.f32 %v448_v14, 0.0  ;;  %v242_v36 = vand.u32 2147483647, %v210_v33 }
  0xbf   :  { %753 = vmatmul.mubr.bf16.gmra.mrb[4].mxu1 %v546_v24  ;;  %v386_v6 = vsub.f32 %v334_v19, %v1130_v51  ;;  %v387_v16 = vsub.f32 %v334_v19, %v1133_v54  ;;  %v481_v37 = vmax.f32 %v449_v17, 0.0  ;;  %v288_v5 = vmax.f32 %v256_v63, 0.0 }
  0xc0   :  { %v240_v39 = vand.u32 2147483647, %v208_v40  ;;  %v243_v38 = vand.u32 2147483647, %v211_v62  ;;  %v241_v45 = vand.u32 2147483647, %v209_v23  ;;  %v388_v2 = vsub.f32 %v338_v59, %v1130_v51 }
  0xc1   :  { %v418_v41 = vand.u32 2147483647, %v386_v6  ;;  %v419_v61 = vand.u32 2147483647, %v387_v16  ;;  %v289_v15 = vmax.f32 %v257_v28, 0.0  ;;  %v467_v47 = vsub.f32 1.0, %v435_v30  ;;  %v374_v30 = vpop.permute.xlu0 %373 }
  0xc2   :  { %v362_v7 = vpop.permute.xlu1 %361  ;;  %v498_v32 = vmax.f32 %v466_v31, 0.0  ;;  %v274_v3 = vsub.f32 1.0, %v242_v36  ;;  %v512_v21 = vmul.f32 %v480_v35, %v288_v5  ;;  %v272_v52 = vsub.f32 1.0, %v240_v39 }
  0xc3   :  { %v400_v44 = vsub.f32 %v362_v7, %v1130_v51  ;;  %v450_v34 = vsub.f32 1.0, %v418_v41  ;;  %v451_v48 = vsub.f32 1.0, %v419_v61  ;;  %v401_v49 = vsub.f32 %v362_v7, %v1133_v54 }
  0xc4   :  { %v275_v55 = vsub.f32 1.0, %v243_v38  ;;  %v273_v58 = vsub.f32 1.0, %v241_v45  ;;  %v513_v0 = vmul.f32 %v481_v37, %v289_v15  ;;  %v499_v1 = vmax.f32 %v467_v47, 0.0 }
  0xc5   :  { %v432_v56 = vand.u32 2147483647, %v400_v44  ;;  %v482_v25 = vmax.f32 %v450_v34, 0.0  ;;  %v483_v53 = vmax.f32 %v451_v48, 0.0  ;;  %v433_v60 = vand.u32 2147483647, %v401_v49 }
  0xc6   :  { %v306_v8 = vmax.f32 %v274_v3, 0.0  ;;  %v304_v11 = vmax.f32 %v272_v52, 0.0  ;;  %v389_v26 = vsub.f32 %v338_v59, %v1133_v54  ;;  %v307_v12 = vmax.f32 %v275_v55, 0.0 }
  0xc7   :  { %v137_v57 = vpop.permute.xlu1 %136  ;;  %v464_v4 = vsub.f32 1.0, %v432_v56  ;;  %v514_v9 = vmul.f32 %v482_v25, %v1225_v50  ;;  %v515_v10 = vmul.f32 %v483_v53, %v291_v27  ;;  %v465_v29 = vsub.f32 1.0, %v433_v60 }
  0xc8   :  { %v305_v14 = vmax.f32 %v273_v58, 0.0  ;;  %v196_v33 = vsub.f32 %v137_v57, %v1122_v42  ;;  %v197_v19 = vsub.f32 %v137_v57, %v1124_v43  ;;  %v420_v63 = vand.u32 2147483647, %v388_v2 }
  0xc9   :  { %v496_v13 = vmax.f32 %v464_v4, 0.0  ;;  %v497_v17 = vmax.f32 %v465_v29, 0.0  ;;  %v541_v62 = vpack.c.bf16 %v515_v10, %v513_v0  ;;  %v540_v20 = vpack.c.bf16 %v514_v9, %v512_v21 }
  0xca   :  { %v530_v23 = vmul.f32 %v498_v32, %v306_v8  ;;  %v262_v24 = vsub.f32 1.0, %v1235_v18  ;;  %v263_v27 = vsub.f32 1.0, %v1240_v22  ;;  %v531_v28 = vmul.f32 %v499_v1, %v307_v12 }
  0xcb   :  { %v177_v46 = vpop.permute.xlu1 %176  ;;  %v528_v40 = vmul.f32 %v496_v13, %v304_v11  ;;  %v529_v50 = vmul.f32 %v497_v17, %v305_v14  ;;  %728 = vmatprep.mubr.bf16.mxu0 %v541_v62  ;;  %v421_v35 = vand.u32 2147483647, %v389_v26  ;;  %v228_v36 = vand.u32 2147483647, %v196_v33 }
  0xcc   :  { %v229_v6 = vand.u32 2147483647, %v197_v19  ;;  %729 = vmatmul.mubr.bf16.gmra.mrb[8].mxu0 %v540_v20  ;;  %v452_v7 = vsub.f32 1.0, %v420_v63  ;;  %v406_v39 = vsub.f32 %v374_v30, %v1130_v51  ;;  %v407_v38 = vsub.f32 %v374_v30, %v1133_v54 }
  0xcd   :  { %v548_v16 = vpack.c.bf16 %v530_v23, %v528_v40  ;;  %v549_v5 = vpack.c.bf16 %v531_v28, %v529_v50  ;;  %v294_v22 = vmax.f32 %v262_v24, 0.0  ;;  %v295_v45 = vmax.f32 %v263_v27, 0.0 }
  0xce   :  { %v212_v41 = vsub.f32 %v177_v46, %v1122_v42  ;;  %v453_v61 = vsub.f32 1.0, %v421_v35  ;;  %v260_v15 = vsub.f32 1.0, %v228_v36  ;;  %v261_v47 = vsub.f32 1.0, %v229_v6 }
  0xcf   :  { %v182_v31 = vpop.permute.xlu1 %181  ;;  %760 = vmatprep.mubr.bf16.mxu1 %v549_v5  ;;  %v213_v32 = vsub.f32 %v177_v46, %v1124_v43  ;;  %v484_v3 = vmax.f32 %v452_v7, 0.0  ;;  %v438_v21 = vand.u32 2147483647, %v406_v39  ;;  %v439_v52 = vand.u32 2147483647, %v407_v38 }
  0xd0   :  { %v214_v37 = vsub.f32 %v182_v31, %v1122_v42  ;;  %v215_v18 = vsub.f32 %v182_v31, %v1124_v43  ;;  %761 = vmatmul.mubr.bf16.gmra.mrb[8].mxu1 %v548_v16  ;;  %v244_v56 = vand.u32 2147483647, %v212_v41  ;;  %v485_v58 = vmax.f32 %v453_v61, 0.0 }
  0xd1   :  { %v292_v59 = vmax.f32 %v260_v15, 0.0  ;;  %v293_v25 = vmax.f32 %v261_v47, 0.0  ;;  %v245_v53 = vand.u32 2147483647, %v213_v32  ;;  %v470_v4 = vsub.f32 1.0, %v438_v21 }
  0xd2   :  { %v246_v34 = vand.u32 2147483647, %v214_v37  ;;  %v247_v55 = vand.u32 2147483647, %v215_v18  ;;  %v471_v8 = vsub.f32 1.0, %v439_v52  ;;  %v276_v29 = vsub.f32 1.0, %v244_v56 }
  0xd3   :  { %v516_v13 = vmul.f32 %v484_v3, %v292_v59  ;;  %v517_v46 = vmul.f32 %v485_v58, %v293_v25  ;;  %v277_v14 = vsub.f32 1.0, %v245_v53  ;;  %v502_v62 = vmax.f32 %v470_v4, 0.0 }
  0xd4   :  { %v342_v44 = vpop.permute.xlu1 %341  ;;  %v278_v43 = vsub.f32 1.0, %v246_v34  ;;  %v279_v9 = vsub.f32 1.0, %v247_v55  ;;  %v308_v23 = vmax.f32 %v276_v29, 0.0 }
  0xd5   :  { %v390_v48 = vsub.f32 %v342_v44, %v1130_v51  ;;  %v391_v49 = vsub.f32 %v342_v44, %v1133_v54  ;;  %v309_v28 = vmax.f32 %v277_v14, 0.0 }
  0xd6   :  { %v310_v33 = vmax.f32 %v278_v43, 0.0  ;;  %v311_v20 = vmax.f32 %v279_v9, 0.0 }
  0xd7   :  { %v422_v57 = vand.u32 2147483647, %v390_v48  ;;  %v423_v42 = vand.u32 2147483647, %v391_v49 }
  0xd8   :  { %v370_v60 = vpop.permute.xlu1 %369  ;;  %v534_v31 = vmul.f32 %v502_v62, %v310_v33 }
  0xd9   :  { %v454_v0 = vsub.f32 1.0, %v422_v57  ;;  %v455_v1 = vsub.f32 1.0, %v423_v42  ;;  %v404_v2 = vsub.f32 %v370_v60, %v1130_v51  ;;  %v405_v10 = vsub.f32 %v370_v60, %v1133_v54 }
  0xda   :  { %v503_v54 = vmax.f32 %v471_v8, 0.0 }
  0xdb   :  { %v486_v11 = vmax.f32 %v454_v0, 0.0  ;;  %v487_v26 = vmax.f32 %v455_v1, 0.0  ;;  %v436_v12 = vand.u32 2147483647, %v404_v2  ;;  %v437_v17 = vand.u32 2147483647, %v405_v10 }
  0xdc   :  { %v535_v36 = vmul.f32 %v503_v54, %v311_v20 }
  0xdd   :  { %v518_v19 = vmul.f32 %v486_v11, %v294_v22  ;;  %v519_v63 = vmul.f32 %v487_v26, %v295_v45  ;;  %v468_v40 = vsub.f32 1.0, %v436_v12  ;;  %v469_v51 = vsub.f32 1.0, %v437_v17 }
  0xdf   :  { %v500_v50 = vmax.f32 %v468_v40, 0.0  ;;  %v543_v24 = vpack.c.bf16 %v519_v63, %v517_v46  ;;  %v542_v27 = vpack.c.bf16 %v518_v19, %v516_v13  ;;  %v501_v30 = vmax.f32 %v469_v51, 0.0 }
  0xe1   :  { %v532_v35 = vmul.f32 %v500_v50, %v308_v23  ;;  %736 = vmatprep.mubr.bf16.mxu0 %v543_v24  ;;  %v533_v6 = vmul.f32 %v501_v30, %v309_v28 }
  0xe2   :  { %737 = vmatmul.mubr.bf16.gmra.mrb[12].mxu0 %v542_v27 }
  0xe3   :  { %v550_v16 = vpack.c.bf16 %v534_v31, %v532_v35  ;;  %v551_v7 = vpack.c.bf16 %v535_v36, %v533_v6 }
  0xe5   :  { %768 = vmatprep.mubr.bf16.mxu1 %v551_v7 }
  0xe6   :  { %769 = vmatmul.mubr.bf16.gmra.mrb[12].mxu1 %v550_v16 }
 0x183   :  { %v857_v37 = vpop.f32.mrb[0].mxu0 }
 0x184   :  { %v858_v5 = vpop.f32.mrb[1].mxu0 }
 0x185   :  { %v859_v39 = vadd.f32 %v858_v5, %v857_v37  ;;  %v860_v38 = vpop.f32.mrb[2].mxu0 }
 0x186   :  { %v861_v18 = vpop.f32.mrb[3].mxu0 }
 0x187   :  { %v881_v22 = vpop.f32.mrb[0].mxu1  ;;  %777 = vst [vmem:[#allocation2] sm:$0xff] %v859_v39  ;;  %v862_v45 = vadd.f32 %v861_v18, %v860_v38 }
 0x188   :  { %v882_v41 = vpop.f32.mrb[1].mxu1 }
 0x189   :  { %v883_v61 = vadd.f32 %v882_v41, %v881_v22  ;;  %v884_v15 = vpop.f32.mrb[2].mxu1  ;;  %778 = vst [vmem:[#allocation2 + $0x8] sm:$0xff] %v862_v45 }
 0x18a   :  { %v885_v47 = vpop.f32.mrb[3].mxu1 }
 0x18b   :  { %785 = vst [vmem:[#allocation2 + $0x40] sm:$0xff] %v883_v61  ;;  %v886_v32 = vadd.f32 %v885_v47, %v884_v15 }
 0x18d   :  { %786 = vst [vmem:[#allocation2 + $0x48] sm:$0xff] %v886_v32 }
 0x18e   :  { %v863_v44 = vpop.f32.mrb[4].mxu0 }
 0x18f   :  { %v864_v3 = vpop.f32.mrb[5].mxu0 }
 0x190   :  { %v865_v34 = vadd.f32 %v864_v3, %v863_v44  ;;  %v866_v48 = vpop.f32.mrb[6].mxu0 }
 0x191   :  { %v867_v49 = vpop.f32.mrb[7].mxu0 }
 0x192   :  { %779 = vst [vmem:[#allocation2 + $0x10] sm:$0xff] %v865_v34  ;;  %v868_v21 = vadd.f32 %v867_v49, %v866_v48  ;;  %v887_v52 = vpop.f32.mrb[4].mxu1 }
 0x193   :  { %v888_v55 = vpop.f32.mrb[5].mxu1 }
 0x194   :  { %780 = vst [vmem:[#allocation2 + $0x18] sm:$0xff] %v868_v21  ;;  %v889_v56 = vadd.f32 %v888_v55, %v887_v52  ;;  %v890_v57 = vpop.f32.mrb[6].mxu1 }
 0x195   :  { %v891_v42 = vpop.f32.mrb[7].mxu1 }
 0x196   :  { %787 = vst [vmem:[#allocation2 + $0x50] sm:$0xff] %v889_v56  ;;  %v892_v58 = vadd.f32 %v891_v42, %v890_v57 }
 0x198   :  { %788 = vst [vmem:[#allocation2 + $0x58] sm:$0xff] %v892_v58 }
 0x19f   :  { %v869_v59 = vpop.f32.mrb[8].mxu0 }
 0x1a0   :  { %v870_v25 = vpop.f32.mrb[9].mxu0 }
 0x1a1   :  { %v871_v53 = vadd.f32 %v870_v25, %v869_v59  ;;  %v872_v60 = vpop.f32.mrb[10].mxu0 }
 0x1a2   :  { %v873_v43 = vpop.f32.mrb[11].mxu0 }
 0x1a3   :  { %781 = vst [vmem:[#allocation2 + $0x20] sm:$0xff] %v871_v53  ;;  %v874_v0 = vadd.f32 %v873_v43, %v872_v60  ;;  %v893_v1 = vpop.f32.mrb[8].mxu1 }
 0x1a4   :  { %v894_v2 = vpop.f32.mrb[9].mxu1 }
 0x1a5   :  { %782 = vst [vmem:[#allocation2 + $0x28] sm:$0xff] %v874_v0  ;;  %v895_v4 = vadd.f32 %v894_v2, %v893_v1  ;;  %v896_v8 = vpop.f32.mrb[10].mxu1 }
 0x1a6   :  { %v897_v9 = vpop.f32.mrb[11].mxu1 }
 0x1a7   :  { %789 = vst [vmem:[#allocation2 + $0x60] sm:$0xff] %v895_v4  ;;  %v898_v10 = vadd.f32 %v897_v9, %v896_v8 }
 0x1a9   :  { %790 = vst [vmem:[#allocation2 + $0x68] sm:$0xff] %v898_v10 }
 0x1b5   :  { %v875_v29 = vpop.f32.mrb[12].mxu0 }
 0x1b6   :  { %v876_v11 = vpop.f32.mrb[13].mxu0 }
 0x1b7   :  { %v877_v26 = vadd.f32 %v876_v11, %v875_v29  ;;  %v878_v12 = vpop.f32.mrb[14].mxu0 }
 0x1b8   :  { %v879_v13 = vpop.f32.mrb[15].mxu0 }
 0x1b9   :  { %783 = vst [vmem:[#allocation2 + $0x30] sm:$0xff] %v877_v26  ;;  %v880_v46 = vadd.f32 %v879_v13, %v878_v12  ;;  %v899_v14 = vpop.f32.mrb[12].mxu1 }
 0x1ba   :  { %v900_v17 = vpop.f32.mrb[13].mxu1 }
 0x1bb   :  { %784 = vst [vmem:[#allocation2 + $0x38] sm:$0xff] %v880_v46  ;;  %v901_v33 = vadd.f32 %v900_v17, %v899_v14  ;;  %v902_v19 = vpop.f32.mrb[14].mxu1 }
 0x1bc   :  { %v903_v63 = vpop.f32.mrb[15].mxu1 }
 0x1bd   :  { %791 = vst [vmem:[#allocation2 + $0x70] sm:$0xff] %v901_v33  ;;  %v904_v40 = vadd.f32 %v903_v63, %v902_v19 }
 0x1bf   :  { %792 = vst [vmem:[#allocation2 + $0x78] sm:$0xff] %v904_v40 }
 0x1c0   :  { %963 = shalt.err (!%p960_p4)
}
 0x1c1   :  { %s964_s20 = scalar_lea.hbm %s1281_s2, 2048 }
 0x1c2   :  { %p965_p5 = scmp.ne.s32.totalorder %s1281_s2, %s964_s20  ;;  %p968_p6 = scmp.lt.u32.totalorder %s964_s20, %s1281_s2 }
 0x1c4   :  { %p970_p7 = pnand %p968_p6, %p965_p5 }
 0x1c6   :  { %973 = shalt.err (!%p970_p7)
}
 0x1c7   :  { %s979_s25 = smov 128   ;;  %s980_s26 = smov 8  }
 0x1c8   :  { %804 = dma.vmem_to_hbm [thread:$0]  %s799_s16, 2048, %s1281_s2, [#allocation3], %s979_s25, %s979_s25, %s980_s26  }
 0x1c9   :  { %974 = dma.done.wait [#allocation3], 2048  }
 0x1ca   :  { %975 = vsyncadd [#allocation3], 4294965248 }
 0x1cb   :  { %808 = vsyncpa [#allocation3], 1 }

</bundles_post_ra>
